<compile_context>
chip_gen: v6e
topology: v6e:2x2x1
jax: 0.10.0
libtpu: 0.0.40
codegen_flags: <defaults>
</compile_context>

<pallas_src>
import math
from functools import partial

import jax
import jax.numpy as jnp
from jax.experimental import pallas as pl
from jax.experimental.pallas import tpu as pltpu

SQRT_2_OVER_PI = math.sqrt(2.0 / math.pi)


def _gelu_tanh(x):
    # BERT / GPT tanh-approximate GELU (matches the torch.jit.script gelu).
    return 0.5 * x * (1.0 + jnp.tanh(SQRT_2_OVER_PI * (x + 0.044715 * x * x * x)))


def _round_up(x, m):
    return ((x + m - 1) // m) * m


def _chip_profile():
    """(per-core VMEM bytes, tensorcores per chip, is_v5) — conservative fallback."""
    kind = ""
    try:
        kind = jax.devices()[0].device_kind.lower()
    except Exception:
        pass
    if "v5" in kind:
        return (128 << 20), 1, True
    if "v6" in kind:
        return (128 << 20), 1, False
    # Unknown / v7x-class: assume 64 MiB per TensorCore, 2 cores per chip.
    return (64 << 20), 2, False


def _select_tiles(M, C, H_pad, itemsize, vmem_bytes, num_cores, is_v5):
    """Pick (tm, th) and report the per-step VMEM footprint."""
    if vmem_bytes < (100 << 20):          # 64 MiB-class (v7x)
        tm_target, th_target = 512, 256
    elif is_v5:                           # v5e: ~compute-bound already at 512
        tm_target, th_target = 512, 512
    else:                                 # v6e: needs large tm for intensity
        tm_target, th_target = 1024, 512

    # Hidden chunk: largest 128-aligned divisor of H_pad <= target.
    th = min(th_target, H_pad)
    while H_pad % th:
        th -= 128

    # Row tile: 8-aligned, clipped to M; keep >= 2 row tiles on 2-TC chips.
    tm = min(tm_target, _round_up(M, 8))
    if num_cores > 1 and M > 8:
        tm = min(tm, _round_up(pl.cdiv(M, 2), 8))
    tm = max(8, _round_up(tm, 8))

    def footprint(tm_, th_):
        # double-buffered x / W1 / b1 / W2 / b2 / out tiles + f32 accumulator
        dbl = 2 * itemsize * (tm_ * C + C * th_ + th_ + th_ * C + C + tm_ * C)
        return dbl + tm_ * C * 4

    budget = int(vmem_bytes * 0.8)
    while tm > 8 and footprint(tm, th) > budget:
        tm = max(8, _round_up(tm // 2, 8))
    while th > 128 and footprint(tm, th) > budget:
        th_new = th - 128
        while H_pad % th_new:
            th_new -= 128
        th = th_new

    # Prefer a tm near the target that divides M exactly (no host-side pad).
    if M % tm:
        for cand in range(tm, max(8, tm // 2) - 1, -8):
            if M % cand == 0:
                tm = cand
                break

    return tm, th, footprint(tm, th)


def mlp_kernel(x_ref, w1_ref, b1_ref, w2_ref, b2_ref, o_ref, acc_ref, *, gelu_dtype):
    # x_ref: (tm, C)  w1_ref: (C, th)  b1_ref: (1, th)
    # w2_ref: (th, C) b2_ref: (1, C)   o_ref: (tm, C)   acc_ref: (tm, C) f32
    h_idx = pl.program_id(1)

    @pl.when(h_idx == 0)
    def _():
        acc_ref[...] = jnp.zeros_like(acc_ref)

    # First matmul on native-dtype operands; f32 accumulation on the MXU.
    h = jnp.dot(x_ref[...], w1_ref[...], preferred_element_type=jnp.float32)
    h = h + b1_ref[...].astype(jnp.float32)          # bias add stays in f32
    h = _gelu_tanh(h.astype(gelu_dtype))              # EUP tanh; bf16 on v6e/v7x

    # Second matmul: activated chunk in the weight dtype, f32 accumulate.
    acc_ref[...] += jnp.dot(h.astype(w2_ref.dtype), w2_ref[...],
                            preferred_element_type=jnp.float32)

    @pl.when(h_idx == pl.num_programs(1) - 1)
    def _():
        y = acc_ref[...] + b2_ref[...].astype(jnp.float32)
        # TODO(synk): dropout with p>0 (training) would need pltpu.prng_*;
        # here p=0 / eval -> identity.
        o_ref[...] = y.astype(o_ref.dtype)


def mlp_forward(x, w1, b1, w2, b2):
    """x: (B, T, C) -> (B, T, C). Weights stored (in, out): w1 (C,4C), w2 (4C,C)."""
    B, T, C = x.shape
    H = w1.shape[1]
    M = B * T
    itemsize = jnp.dtype(x.dtype).itemsize

    vmem_bytes, num_cores, is_v5 = _chip_profile()

    # Pad hidden dim to a lane multiple so chunking never degenerates to a
    # full-width weight tile.  Zero-padded W1 cols / b1 / W2 rows are exact
    # no-ops (gelu(0)=0 and the matching W2 rows are zero).
    H_pad = max(128, _round_up(H, 128))
    if H_pad != H:
        w1 = jnp.pad(w1, ((0, 0), (0, H_pad - H)))
        b1 = jnp.pad(b1, ((0, H_pad - H),))
        w2 = jnp.pad(w2, ((0, H_pad - H), (0, 0)))

    tm, th, footprint = _select_tiles(M, C, H_pad, itemsize,
                                      vmem_bytes, num_cores, is_v5)

    M_pad = _round_up(M, tm)
    x2d = x.reshape(M, C)
    if M_pad != M:
        x2d = jnp.pad(x2d, ((0, M_pad - M), (0, 0)))
    b1_2d = b1.reshape(1, H_pad)
    b2_2d = b2.reshape(1, C)

    grid = (M_pad // tm, H_pad // th)
    n_row_tiles = grid[0]

    # Scoped-VMEM limit from the actual footprint (+ headroom), capped below
    # physical per-core VMEM.
    vmem_limit = int(min(max(footprint + (8 << 20), 32 << 20),
                         int(vmem_bytes * 0.95)))

    # GELU in bf16 only when the data is bf16 and the chip has a bf16 VPU/EUP.
    gelu_dtype = jnp.bfloat16 if (x.dtype == jnp.bfloat16 and not is_v5) \
        else jnp.float32

    # Weights are re-streamed once per row tile; activations read + written once.
    cost = pl.CostEstimate(
        flops=4 * M_pad * C * H_pad,                  # two matmuls
        transcendentals=M_pad * H_pad,                # tanh in GELU
        bytes_accessed=(n_row_tiles * (C * H_pad + H_pad + H_pad * C + C)
                        + 2 * M_pad * C) * itemsize,
    )

    out2d = pl.pallas_call(
        partial(mlp_kernel, gelu_dtype=gelu_dtype),
        out_shape=jax.ShapeDtypeStruct((M_pad, C), x.dtype),
        grid_spec=pltpu.PrefetchScalarGridSpec(
            num_scalar_prefetch=0,
            grid=grid,
            in_specs=[
                pl.BlockSpec((tm, C), lambda i, h: (i, 0)),   # x rows
                pl.BlockSpec((C, th), lambda i, h: (0, h)),   # W1 chunk
                pl.BlockSpec((1, th), lambda i, h: (0, h)),   # b1 chunk
                pl.BlockSpec((th, C), lambda i, h: (h, 0)),   # W2 chunk
                pl.BlockSpec((1, C), lambda i, h: (0, 0)),    # b2
            ],
            out_specs=pl.BlockSpec((tm, C), lambda i, h: (i, 0)),
            scratch_shapes=[pltpu.VMEM((tm, C), jnp.float32)],
        ),
        compiler_params=pltpu.CompilerParams(
            dimension_semantics=("parallel", "arbitrary"),
            vmem_limit_bytes=vmem_limit,
        ),
        cost_estimate=cost,
    )(x2d, w1, b1_2d, w2, b2_2d)

    return out2d[:M].reshape(B, T, C)


def mlp_reference(x, w1, b1, w2, b2):
    h = _gelu_tanh(jnp.einsum("btc,ch->bth", x, w1) + b1)
    return jnp.einsum("bth,hc->btc", h, w2) + b2


if __name__ == "__main__":
    # Config: n_embd=32, bias=True, dropout=0.0 (eval semantics)
    B, T, C = 2, 8, 32
    H = 4 * C

    key = jax.random.PRNGKey(0)
    kx, kw1, kb1, kw2, kb2 = jax.random.split(key, 5)

    x = jax.random.normal(kx, (B, T, C), dtype=jnp.float32)
    # deterministic init, roughly matching nn.Linear's uniform(-1/sqrt(fan_in), ...)
    w1 = jax.random.uniform(kw1, (C, H), jnp.float32, -1.0 / math.sqrt(C), 1.0 / math.sqrt(C))
    b1 = jax.random.uniform(kb1, (H,), jnp.float32, -1.0 / math.sqrt(C), 1.0 / math.sqrt(C))
    w2 = jax.random.uniform(kw2, (H, C), jnp.float32, -1.0 / math.sqrt(H), 1.0 / math.sqrt(H))
    b2 = jax.random.uniform(kb2, (C,), jnp.float32, -1.0 / math.sqrt(H), 1.0 / math.sqrt(H))

    out = mlp_forward(x, w1, b1, w2, b2)
    out = jax.block_until_ready(out)
    ref = mlp_reference(x, w1, b1, w2, b2)
    assert out.shape == (B, T, C)
    assert jnp.allclose(out, ref, atol=1e-5, rtol=1e-5), "mismatch vs JAX reference"

    # Exercise the ragged-M padding path (B*T not a multiple of 8).
    x_r = jax.random.normal(kx, (2, 9, C), dtype=jnp.float32)
    out_r = jax.block_until_ready(mlp_forward(x_r, w1, b1, w2, b2))
    ref_r = mlp_reference(x_r, w1, b1, w2, b2)
    assert jnp.allclose(out_r, ref_r, atol=1e-5, rtol=1e-5), "ragged-M mismatch"

    print("KERNEL_OK")
</pallas_src>

<mosaic_0001>
module attributes {stable_mosaic.version = 11 : i64} {
  func.func @mlp_kernel(%arg0: i32, %arg1: i32, %arg2: memref<8x32xf32, #tpu.memory_space<vmem>>, %arg3: memref<32x128xf32, #tpu.memory_space<vmem>>, %arg4: memref<1x128xf32, #tpu.memory_space<vmem>>, %arg5: memref<128x32xf32, #tpu.memory_space<vmem>>, %arg6: memref<1x32xf32, #tpu.memory_space<vmem>>, %arg7: memref<8x32xf32, #tpu.memory_space<vmem>>, %arg8: memref<8x32xf32, #tpu.memory_space<vmem>>) attributes {dimension_semantics = [#tpu.dimension_semantics<parallel>, #tpu.dimension_semantics<arbitrary>], iteration_bounds = array<i64: 2, 1>, scalar_prefetch = 0 : i64, scratch_operands = 1 : i64, tpu.core_type = #tpu.core_type<tc>, window_params = [{transform_indices = @transform_0, window_bounds = array<i64: 8, 32>}, {transform_indices = @transform_1, window_bounds = array<i64: 32, 128>}, {transform_indices = @transform_2, window_bounds = array<i64: 1, 128>}, {transform_indices = @transform_3, window_bounds = array<i64: 128, 32>}, {pipeline_mode = #tpu.pipeline_mode<synchronous>, transform_indices = @transform_4, window_bounds = array<i64: 1, 32>}, {transform_indices = @transform_5, window_bounds = array<i64: 8, 32>}]} {
    %c0_i32 = arith.constant 0 : i32
    %0 = arith.cmpi eq, %arg1, %c0_i32 : i32
    %1 = arith.extui %0 : i1 to i32
    %c0_i32_0 = arith.constant 0 : i32
    %2 = arith.cmpi ne, %1, %c0_i32_0 : i32
    scf.if %2 {
      %cst_19 = arith.constant 0.000000e+00 : f32
      %30 = vector.broadcast %cst_19 : f32 to vector<8x32xf32>
      %c0_20 = arith.constant 0 : index
      %c0_21 = arith.constant 0 : index
      %31 = vector.load %arg8[%c0_20, %c0_21] : memref<8x32xf32, #tpu.memory_space<vmem>>, vector<8x32xf32>
      tpu.vector_store %arg8[%c0_20, %c0_21], %30 {strides = array<i32>} : memref<8x32xf32, #tpu.memory_space<vmem>>, vector<8x32xf32>,
    } else {
    }
    %c0 = arith.constant 0 : index
    %c0_1 = arith.constant 0 : index
    %3 = vector.load %arg2[%c0, %c0_1] : memref<8x32xf32, #tpu.memory_space<vmem>>, vector<8x32xf32>
    %c0_2 = arith.constant 0 : index
    %c0_3 = arith.constant 0 : index
    %4 = vector.load %arg3[%c0_2, %c0_3] : memref<32x128xf32, #tpu.memory_space<vmem>>, vector<32x128xf32>
    %cst = arith.constant dense<0.000000e+00> : vector<8x128xf32>
    %5 = tpu.matmul %3, %4, %cst {dimension_numbers = #tpu.dot_dimension_numbers<[1], [0], [0], [1], [0, 0, 1, 1], [], []>} : vector<8x32xf32>, vector<32x128xf32>, vector<8x128xf32> -> vector<8x128xf32>
    %c0_4 = arith.constant 0 : index
    %c0_5 = arith.constant 0 : index
    %6 = vector.load %arg4[%c0_4, %c0_5] : memref<1x128xf32, #tpu.memory_space<vmem>>, vector<1x128xf32>
    %7 = vector.broadcast %6 : vector<1x128xf32> to vector<8x128xf32>
    %8 = arith.addf %5, %7 : vector<8x128xf32>
    %cst_6 = arith.constant 5.000000e-01 : f32
    %9 = vector.broadcast %cst_6 : f32 to vector<8x128xf32>
    %10 = arith.mulf %9, %8 : vector<8x128xf32>
    %cst_7 = arith.constant 4.471500e-02 : f32
    %11 = vector.broadcast %cst_7 : f32 to vector<8x128xf32>
    %12 = arith.mulf %11, %8 : vector<8x128xf32>
    %13 = arith.mulf %12, %8 : vector<8x128xf32>
    %14 = arith.mulf %13, %8 : vector<8x128xf32>
    %15 = arith.addf %8, %14 : vector<8x128xf32>
    %cst_8 = arith.constant 0.797884583 : f32
    %16 = vector.broadcast %cst_8 : f32 to vector<8x128xf32>
    %17 = arith.mulf %16, %15 : vector<8x128xf32>
    %18 = math.tanh %17 : vector<8x128xf32>
    %cst_9 = arith.constant 1.000000e+00 : f32
    %19 = vector.broadcast %cst_9 : f32 to vector<8x128xf32>
    %20 = arith.addf %19, %18 : vector<8x128xf32>
    %21 = arith.mulf %10, %20 : vector<8x128xf32>
    %c0_10 = arith.constant 0 : index
    %c0_11 = arith.constant 0 : index
    %22 = vector.load %arg8[%c0_10, %c0_11] : memref<8x32xf32, #tpu.memory_space<vmem>>, vector<8x32xf32>
    %c0_12 = arith.constant 0 : index
    %c0_13 = arith.constant 0 : index
    %23 = vector.load %arg5[%c0_12, %c0_13] : memref<128x32xf32, #tpu.memory_space<vmem>>, vector<128x32xf32>
    %cst_14 = arith.constant dense<0.000000e+00> : vector<8x32xf32>
    %24 = tpu.matmul %21, %23, %cst_14 {dimension_numbers = #tpu.dot_dimension_numbers<[1], [0], [0], [1], [0, 0, 1, 1], [], []>} : vector<8x128xf32>, vector<128x32xf32>, vector<8x32xf32> -> vector<8x32xf32>
    %25 = arith.addf %22, %24 : vector<8x32xf32>
    %c0_15 = arith.constant 0 : index
    %c0_16 = arith.constant 0 : index
    %26 = vector.load %arg8[%c0_15, %c0_16] : memref<8x32xf32, #tpu.memory_space<vmem>>, vector<8x32xf32>
    tpu.vector_store %arg8[%c0_15, %c0_16], %25 {strides = array<i32>} : memref<8x32xf32, #tpu.memory_space<vmem>>, vector<8x32xf32>,
    %c0_i32_17 = arith.constant 0 : i32
    %27 = arith.cmpi eq, %arg1, %c0_i32_17 : i32
    %28 = arith.extui %27 : i1 to i32
    %c0_i32_18 = arith.constant 0 : i32
    %29 = arith.cmpi ne, %28, %c0_i32_18 : i32
    scf.if %29 {
      %c0_19 = arith.constant 0 : index
      %c0_20 = arith.constant 0 : index
      %30 = vector.load %arg8[%c0_19, %c0_20] : memref<8x32xf32, #tpu.memory_space<vmem>>, vector<8x32xf32>
      %c0_21 = arith.constant 0 : index
      %c0_22 = arith.constant 0 : index
      %31 = vector.load %arg6[%c0_21, %c0_22] : memref<1x32xf32, #tpu.memory_space<vmem>>, vector<1x32xf32>
      %32 = vector.broadcast %31 : vector<1x32xf32> to vector<8x32xf32>
      %33 = arith.addf %30, %32 : vector<8x32xf32>
      %c0_23 = arith.constant 0 : index
      %c0_24 = arith.constant 0 : index
      %34 = vector.load %arg7[%c0_23, %c0_24] : memref<8x32xf32, #tpu.memory_space<vmem>>, vector<8x32xf32>
      tpu.vector_store %arg7[%c0_23, %c0_24], %33 {strides = array<i32>} : memref<8x32xf32, #tpu.memory_space<vmem>>, vector<8x32xf32>,
    } else {
    }
    return
  }
  func.func @transform_0(%arg0: i32, %arg1: i32) -> (i32, i32) {
    %c0_i32 = arith.constant 0 : i32
    %c0_i32_0 = arith.constant 0 : i32
    return %arg0, %c0_i32 : i32, i32
  }
  func.func @transform_1(%arg0: i32, %arg1: i32) -> (i32, i32) {
    %c0_i32 = arith.constant 0 : i32
    %c0_i32_0 = arith.constant 0 : i32
    return %c0_i32, %arg1 : i32, i32
  }
  func.func @transform_2(%arg0: i32, %arg1: i32) -> (i32, i32) {
    %c0_i32 = arith.constant 0 : i32
    %c0_i32_0 = arith.constant 0 : i32
    return %c0_i32, %arg1 : i32, i32
  }
  func.func @transform_3(%arg0: i32, %arg1: i32) -> (i32, i32) {
    %c0_i32 = arith.constant 0 : i32
    %c0_i32_0 = arith.constant 0 : i32
    return %arg1, %c0_i32 : i32, i32
  }
  func.func @transform_4(%arg0: i32, %arg1: i32) -> (i32, i32) {
    %c0_i32 = arith.constant 0 : i32
    %c0_i32_0 = arith.constant 0 : i32
    %c0_i32_1 = arith.constant 0 : i32
    return %c0_i32, %c0_i32_0 : i32, i32
  }
  func.func @transform_5(%arg0: i32, %arg1: i32) -> (i32, i32) {
    %c0_i32 = arith.constant 0 : i32
    %c0_i32_0 = arith.constant 0 : i32
    return %arg0, %c0_i32 : i32, i32
  }
}

</mosaic_0001>

<bundles_post_ra>
// kernel: tpu_custom_call.1
= control target key start
LH: loop header
LB: loop body
LE: loop exit
PB: predicated region body
PF: predicated region fallthrough
CT: control target
= control target key end

     0   :  { %10 = vsyncpa [#allocation4], 0  ;;  %s1058_s0 = inlined_call_operand.vmem [shape: f32[16,32], index: 0, kind: input, shape index: {}]   ;;  %s1059_s1 = inlined_call_operand.vmem [shape: f32[32,128], index: 1, kind: input, shape index: {}]   ;;  %s1060_s2 = inlined_call_operand.vmem [shape: f32[1,128], index: 2, kind: input, shape index: {}]   ;;  %s1061_s3 = inlined_call_operand.vmem [shape: f32[128,32], index: 3, kind: input, shape index: {}]   ;;  %s1062_s4 = inlined_call_operand.vmem [shape: f32[1,32], index: 4, kind: input, shape index: {}]   ;;  %s1063_s5 = inlined_call_operand.hbm [shape: f32[16,32], index: 5, kind: output, shape index: {}]  }
   0x1   :  { %12 = vsyncpa [#allocation4 + $0x1], 0  ;;  %s866_s18 = smov 0   ;;  %s868_s19 = smov 0  }
   0x2   :  { %s870_s20 = smov 0   ;;  %s872_s21 = smov 0  }
   0x3   :  { %s874_s22 = smov 0   ;;  %s876_s23 = smov 0  }
   0x4 LB: > { %s611_s24 = sadd.s32 4294967295, %s831_s23   ;;  %s612_s25 = sadd.s32 4294967294, %s831_s23   ;;  %s831_s23 = sphi %s876_s23, %s18_s23   ;;  %s827_s22 = sphi %s874_s22, %s1070_s22   ;;  %s823_s21 = sphi %s872_s21, %s1069_s21   ;;  %s819_s20 = sphi %s870_s20, %s1068_s20   ;;  %s815_s19 = sphi %s868_s19, %s1067_s19   ;;  %s811_s18 = sphi %s866_s18, %s1066_s18  }
   0x5   : > { %s30_s26 = sadd.s32 1, %s827_s22  ;;  %s162_s27 = sadd.s32 1, %s819_s20 }
   0x6   : > { %p32_p0 = scmp.ge.s32.totalorder %s30_s26, 2  ;;  %p172_p1 = scmp.ne.s32.totalorder %s819_s20, %s815_s19 }
   0x7   : > { %p173_p2 = scmp.eq.s32.totalorder %s611_s24, 1  ;;  %p178_p3 = scmp.ne.s32.totalorder %s815_s19, %s811_s18 }
   0x8   : > { %s1072_s26 = smov (%p32_p0, %s30_s26), 0  ;;  %p179_p5 = scmp.eq.s32.totalorder %s612_s25, 1 }
   0x9   : > { %p906_p4 = por %p173_p2, %p172_p1  ;;  %s159_s29 = ssub.s32 %s827_s22, %s1072_s26 }
   0xa   : > { %p618_p6 = scmp.ge.s32.totalorder %s831_s23, 1  ;;  %p160_p7 = scmp.eq.s32.totalorder %s159_s29, 0 }
   0xb   : > { %p913_p8 = por %p179_p5, %p178_p3  ;;  %p229_p9 = scmp.lt.s32.totalorder %s831_s23, 3 }
   0xc   : > { %s919_s6 = scalar_select %p160_p7, %s819_s20, %s162_s27  }
   0xd   : > { %p230_p10 = pnand %p618_p6, %p229_p9 }
   0xe   : > { %p268_p11 = scmp.lt.s32.totalorder (!%p230_p10), %s823_s21, 1  ;;  %s265_s9 = sand.u32 (!%p230_p10), 1, %s815_s19  }
   0xf   : > { %233 = sbr.rel (%p230_p10) target bundleno = 470 (0x1d6), region = 40  ;;  %s619_s10 = sshll.u32 (!%p230_p10), %s265_s9, 3 }
  0x10   : > { %s625_s13 = sshll.u32 (!%p230_p10), %s823_s21, 7  ;;  %s835_s29 = smov (!%p230_p10), [#allocation3]  }
  0x11   : > { %s500_s24 = scalar_lea.hbm (!%p230_p10), %s1063_s5, %s625_s13  ;;  %s759_s7 = sshll.u32 (!%p230_p10), %s835_s29, 4  ;;  %s760_s7 = int_to_ptr.vmem [resolvable:$false] %s759_s7 }
  0x14   : > { %v295_v0 = vld [vmem:[%s1059_s1 + $0x18] sm:$0xff]  ;;  %v833_v1 = vmov 0.0   ;;  %v294_v2 = vld [vmem:[%s1059_s1 + $0x10] sm:$0xff]  ;;  %vm834_vm0 = vmmov 0   ;;  %vm289_vm1 = vcmask 261120   ;;  %s269_s11 = scalar_select %p268_p11, %s823_s21, 1 }
  0x15   : > { %650 = vmatprep.subr.mxu0 %v833_v1  ;;  %658 = vmatprep.mubr.msk.f32.mxu0 %vm834_vm0, %v833_v1  ;;  %290 = vst.msk [vmem:[#allocation2] sm:$0xff] %vm289_vm1, %v833_v1  ;;  %v293_v3 = vld [vmem:[%s1059_s1 + $0x8] sm:$0xff]  ;;  %v292_v4 = vld [vmem:[%s1059_s1] sm:$0xff]  ;;  %v402_v6 = vld [vmem:[%s1061_s3 + $0x78] sm:$0xff]  ;;  %s761_s21 = scalar_lea.vmem %s760_s7, 256 }
  0x16   : > { %651 = vmatpush3.msra.mxu0 %v295_v0  ;;  %661 = vmatprep.subr.mxu1 %v833_v1  ;;  %s620_s14 = sshll.u32 %s269_s11, 3  ;;  %v401_v7 = vld [vmem:[%s1061_s3 + $0x70] sm:$0xff]  ;;  %v400_v8 = vld [vmem:[%s1061_s3 + $0x68] sm:$0xff]  ;;  %v399_v9 = vld [vmem:[%s1061_s3 + $0x60] sm:$0xff] }
  0x17   : > { %652 = vmatprep.subr.mxu0 %v833_v1  ;;  %693 = vmatprep.mubr.msk.f32.mxu1 %vm834_vm0, %v833_v1  ;;  %s271_s25 = scalar_lea.vmem %s1058_s0, %s620_s14  ;;  %v398_v10 = vld [vmem:[%s1061_s3 + $0x58] sm:$0xff]  ;;  %v397_v11 = vld [vmem:[%s1061_s3 + $0x50] sm:$0xff]  ;;  %v396_v12 = vld [vmem:[%s1061_s3 + $0x48] sm:$0xff]  ;;  %s267_s14 = scalar_lea.vmem [#allocation3], %s619_s10 }
  0x18   : > { %653 = vmatpush3.msra.mxu0 %v294_v2  ;;  %v291_v5 = vld [vmem:[%s271_s25] sm:$0xff]  ;;  %662 = vmatpush3.msra.mxu1 %v402_v6  ;;  %v394_v14 = vld [vmem:[%s1061_s3 + $0x38] sm:$0xff]  ;;  %v393_v15 = vld [vmem:[%s1061_s3 + $0x30] sm:$0xff]  ;;  %s502_s15 = sshll.u32 %s267_s14, 4  ;;  %s489_s25 = scalar_lea.sflag [#allocation4], %s265_s9  ;;  %s503_s15 = int_to_ptr.vmem [resolvable:$true] %s502_s15 }
  0x19   : > { %654 = vmatprep.subr.mxu0 %v833_v1  ;;  %663 = vmatprep.subr.mxu1 %v833_v1  ;;  %v395_v13 = vld [vmem:[%s1061_s3 + $0x40] sm:$0xff]  ;;  %v392_v16 = vld [vmem:[%s1061_s3 + $0x28] sm:$0xff]  ;;  %v390_v18 = vld [vmem:[%s1061_s3 + $0x18] sm:$0xff]  ;;  %s755_s27 = scalar_lea.vmem %s503_s15, 128  ;;  %p762_p1 = scmp.lt.s32.totalorder %s503_s15, %s760_s7 }
  0x1a   : > { %655 = vmatpush3.msra.mxu0 %v293_v3  ;;  %664 = vmatpush3.msra.mxu1 %v401_v7  ;;  %v391_v17 = vld [vmem:[%s1061_s3 + $0x20] sm:$0xff]  ;;  %v389_v19 = vld [vmem:[%s1061_s3 + $0x10] sm:$0xff]  ;;  %v388_v20 = vld [vmem:[%s1061_s3 + $0x8] sm:$0xff]  ;;  %p756_p12 = scmp.ne.s32.totalorder %s503_s15, %s755_s27  ;;  %p763_p2 = scmp.lt.s32.totalorder %s761_s21, %s755_s27 }
  0x1b   : > { %656 = vmatprep.subr.mxu0 %v833_v1  ;;  %665 = vmatprep.subr.mxu1 %v833_v1  ;;  %v387_v21 = vld [vmem:[%s1061_s3] sm:$0xff] }
  0x1c   : > { %657 = vmatpush3.msra.mxu0 %v292_v4  ;;  %666 = vmatpush3.msra.mxu1 %v400_v8  ;;  %v621_v22 = vld [vmem:[%s1060_s2] ss:$0 sm:$0xff]  ;;  %p757_p13 = pnand %p756_p12, %p906_p4  ;;  %p764_p3 = por %p763_p2, %p762_p1 }
  0x1d   : > { %659 = vmatmul.mubr.msk.f32.vlgmr.msra.gmra.mxu0 %vm289_vm1, %v291_v5  ;;  %667 = vmatprep.subr.mxu1 %v833_v1  ;;  %v386_v35 = vld [vmem:[#allocation2] sm:$0xff] }
  0x1e   : > { %668 = vmatpush3.msra.mxu1 %v399_v9  ;;  %v623_v39 = vld [vmem:[%s1062_s4] ss:$0 sm:$0xff]  ;;  %p758_p0 = pneg %p757_p13 }
  0x1f   : > { %669 = vmatprep.subr.mxu1 %v833_v1 }
  0x20   : > { %670 = vmatpush3.msra.mxu1 %v398_v10  ;;  %p765_p5 = pnand %p764_p3, %p758_p0 }
  0x21   : > { %671 = vmatprep.subr.mxu1 %v833_v1 }
  0x22   : > { %672 = vmatpush3.msra.mxu1 %v397_v11 }
  0x23   : > { %673 = vmatprep.subr.mxu1 %v833_v1 }
  0x24   : > { %674 = vmatpush3.msra.mxu1 %v396_v12 }
  0x25   : > { %675 = vmatprep.subr.mxu1 %v833_v1 }
  0x26   : > { %676 = vmatpush3.msra.mxu1 %v395_v13 }
  0x27   : > { %677 = vmatprep.subr.mxu1 %v833_v1 }
  0x28   : > { %678 = vmatpush3.msra.mxu1 %v394_v14 }
  0x29   : > { %679 = vmatprep.subr.mxu1 %v833_v1 }
  0x2a   : > { %680 = vmatpush3.msra.mxu1 %v393_v15 }
  0x2b   : > { %681 = vmatprep.subr.mxu1 %v833_v1 }
  0x2c   : > { %682 = vmatpush3.msra.mxu1 %v392_v16 }
  0x2d   : > { %683 = vmatprep.subr.mxu1 %v833_v1 }
  0x2e   : > { %684 = vmatpush3.msra.mxu1 %v391_v17 }
  0x2f   : > { %685 = vmatprep.subr.mxu1 %v833_v1 }
  0x30   : > { %686 = vmatpush3.msra.mxu1 %v390_v18 }
  0x31   : > { %687 = vmatprep.subr.mxu1 %v833_v1 }
  0x32   : > { %688 = vmatpush3.msra.mxu1 %v389_v19 }
  0x33   : > { %689 = vmatprep.subr.mxu1 %v833_v1 }
  0x34   : > { %690 = vmatpush3.msra.mxu1 %v388_v20 }
  0x35   : > { %691 = vmatprep.subr.mxu1 %v833_v1 }
  0x36   : > { %692 = vmatpush3.msra.mxu1 %v387_v21 }
  0xdd   : > { %v373_v23 = vpop.f32.mrf.mxu0 }
  0xde   : > { %v374_v24 = vadd.f32 %v621_v22, %v373_v23 }
  0xdf   : > { %v660_v25 = vpop.f32.mrf.mxu0 }
  0xe0   : > { %v378_v26 = vmul.f32 0.044715, %v374_v24  ;;  %v377_v32 = vmul.f32 0.5, %v374_v24 }
  0xe2   : > { %v379_v27 = vmul.f32 %v378_v26, %v374_v24 }
  0xe4   : > { %v380_v28 = vmul.f32 %v379_v27, %v374_v24 }
  0xe6   : > { %v381_v29 = vadd.f32 %v380_v28, %v374_v24 }
  0xe8   : > { %v382_v30 = vmul.f32 0.7978846, %v381_v29 }
  0xea   : > { %753 = vtanh.f32 %v382_v30 }
  0xf7   : > { %v754_v31 = vpop.eup %753 }
  0xf8   : > { %v384_v33 = vadd.f32 1.0, %v754_v31 }
  0xfa   : > { %v385_v34 = vmul.f32 %v384_v33, %v377_v32 }
  0xfc   : > { %694 = vmatmul.mubr.f32.vlgmr.msra.gmra.mxu1 %v385_v34 }
 0x1bc   : > { %v469_v36 = vpop.f32.mrf.mxu1 }
 0x1bd   : > { %v473_v37 = vadd.f32 %v469_v36, %v386_v35 }
 0x1be   : > { %v695_v38 = vpop.f32.mrf.mxu1 }
 0x1bf   : > { %474 = vst.msk [vmem:[#allocation2] sm:$0xff] %vm289_vm1, %v473_v37 }
 0x1c6   : > { %v478_v40 = vld [vmem:[#allocation2] sm:$0xff] }
 0x1c7   : > { %v486_v41 = vadd.f32 %v623_v39, %v478_v40 }
 0x1c9   : > { %487 = vst.msk [vmem:[%s267_s14] sm:$0xff] %vm289_vm1, %v486_v41 }
 0x1ca   : > { %768 = shalt.err (!%p765_p5)
}
 0x1cb   : > { %s769_s8 = scalar_lea.hbm %s500_s24, 128  ;;  %s773_s11 = scalar_lea.hbm %s1063_s5, 256 }
 0x1cc   : > { %p770_p6 = scmp.ne.s32.totalorder %s500_s24, %s769_s8  ;;  %p774_p10 = scmp.lt.s32.totalorder %s500_s24, %s1063_s5 }
 0x1cd   : > { %p775_p11 = scmp.lt.s32.totalorder %s773_s11, %s769_s8 }
 0x1ce   : > { %p771_p7 = pnand %p770_p6, %p906_p4 }
 0x1cf   : > { %p776_p12 = por %p775_p11, %p774_p10 }
 0x1d0   : > { %p772_p9 = pneg %p771_p7 }
 0x1d2   : > { %p777_p13 = pnand %p776_p12, %p772_p9 }
 0x1d4   : > { %780 = shalt.err (!%p777_p13)
}
 0x1d5   : > { %696 = dma.vmem_to_hbm [thread:$0]  (%p906_p4), %s503_s15, 128, %s500_s24, %s489_s25  }
 0x1d6 PF: > { %p702_p0 = scmp.ge.s32.totalorder %s831_s23, 2  ;;  %s514_s14 = sand.u32 1, %s811_s18  }
 0x1d7   : > { %s515_s16 = scalar_lea.sflag [#allocation4], %s514_s14 }
 0x1d8   : > { %p699_p1 = pnand %p702_p0, %p913_p8 }
 0x1da   : > { %p700_p2 = pneg %p699_p1 }
 0x1dc   : > { %806 = dma.done.wait (%p700_p2), %s515_s16, 128  }
 0x1dd   : > { %808 = vsyncadd (%p700_p2), %s515_s16, 4294967168  ;;  %s18_s23 = sadd.s32 1, %s831_s23   ;;  %s1066_s18 = smov %s815_s19 }
 0x1de   : > { %p15_p3 = scmp.ge.s32.totalorder %s18_s23, 4   ;;  %s1067_s19 = smov %s819_s20 }
 0x1df   : > { %s1068_s20 = smov %s919_s6  ;;  %s1069_s21 = smov %s827_s22 }
 0x1e0   : > { %s1070_s22 = smov %s1072_s26  ;;  %17 = sbr.rel (!%p15_p3) target bundleno = 4 (0x4), region = 92 }
 0x1e5   :  { %520 = vsyncpa [#allocation4], 1 }
 0x1e6   :  { %522 = vsyncpa [#allocation4 + $0x1], 1 }

</bundles_post_ra>
